<compile_context>
chip_gen: v7x
topology: tpu7x:2x2x1
jax: 0.10.0
libtpu: 0.0.40
codegen_flags: <defaults>
</compile_context>

<pallas_src>
import functools

import jax
import jax.numpy as jnp
import numpy as np
from jax.experimental import pallas as pl
from jax.experimental.pallas import tpu as pltpu


def tv_grad_kernel(mask_ref, scale_h_ref, scale_w_ref, x_ref, o_ref, *, epsilon, H, W):
    """One block: x_ref is (Cb, H*W) — Cb independent planes, each flattened onto lanes."""
    HW = H * W
    x = x_ref[...].astype(jnp.float32)

    # (1, HW) per-lane constants; broadcast along sublanes only at the use sites.
    mask = mask_ref[...]                 # packed edge bits
    h_first = (mask & 1) != 0
    h_last = (mask & 2) != 0
    w_first = (mask & 4) != 0
    w_last = (mask & 8) != 0
    scale_h = scale_h_ref[...]           # 1.0 on h-edges, 0.5 interior
    scale_w = scale_w_ref[...]           # 1.0 on w-edges, 0.5 interior

    def grad1d(a, step, first, last, scale):
        # torch.gradient(edge_order=1) along the axis whose stride in the
        # flattened plane is `step` (W for d/dH, 1 for d/dW).
        fwd = pltpu.roll(a, HW - step, axis=1)   # a[p + step]  (mod H*W)
        bwd = pltpu.roll(a, step, axis=1)        # a[p - step]  (mod H*W)
        # Select the endpoint value INTO fwd/bwd (wrapped values never reach
        # arithmetic), then one per-lane scale finishes both the central and the
        # one-sided formulas.
        fwd = jnp.where(last, a, fwd)
        bwd = jnp.where(first, a, bwd)
        return (fwd - bwd) * scale

    u0 = grad1d(x, W, h_first, h_last, scale_h)   # d/dH
    u1 = grad1d(x, 1, w_first, w_last, scale_w)   # d/dW

    # One rsqrt on the EUP instead of sqrt + two divides.
    inv = jax.lax.rsqrt(jnp.float32(epsilon) + u0 * u0 + u1 * u1)
    v0 = u0 * inv
    v1 = u1 * inv

    d = grad1d(v0, W, h_first, h_last, scale_h) + grad1d(v1, 1, w_first, w_last, scale_w)
    o_ref[...] = d.astype(o_ref.dtype)


def _default_budgets():
    """(max_block_elems, vmem_limit_bytes) tuned per chip generation."""
    try:
        vmem_cap = int(getattr(pltpu.get_tpu_info(), "vmem_capacity_bytes",
                               64 * 1024 * 1024))
    except Exception:
        vmem_cap = 64 * 1024 * 1024
    if vmem_cap >= 96 * 1024 * 1024:
        # v5e / v6e: 128 MiB VMEM — bigger blocks amortize the ~0.35us/step cost.
        return 1024 * 1024, 64 * 1024 * 1024
    # v7x: 64 MiB per TensorCore — keep ~16x-block footprint under ~48 MiB.
    return 512 * 1024, 48 * 1024 * 1024


def _pick_rows_per_block(n_rows, plane_elems, max_block_elems):
    """Rows (flattened B*C planes) per block; must be a multiple of 8 or == n_rows."""
    min_rows = min(8, n_rows)
    if min_rows * plane_elems > max_block_elems:
        # TODO(synk): very large single (H, W) planes need H-tiling with a 1-row
        # halo; raise instead of silently oversizing (would spill / VMEM-OOM).
        raise NotImplementedError(
            "TV_grad Pallas kernel: a minimal block of %d plane(s) of %d elements "
            "exceeds the VMEM block budget (%d elems); H-tiling with a halo is "
            "not implemented." % (min_rows, plane_elems, max_block_elems))
    if n_rows <= 8:
        return n_rows                      # block dim == full array dim (allowed)
    fit = max(8, min(n_rows, max_block_elems // plane_elems) // 8 * 8)
    # Guarantee >= 2 grid steps so both v7x TensorCores get work, roughly balanced.
    steps = max(2, pl.cdiv(n_rows, fit))
    cb = pl.cdiv(pl.cdiv(n_rows, steps), 8) * 8
    return max(8, min(cb, fit))


def tv_grad(x, epsilon=1.0, *, max_block_elems=None, vmem_limit_bytes=None):
    B, C, H, W = x.shape
    if H < 2 or W < 2:
        raise ValueError("TV_grad requires H >= 2 and W >= 2 (torch.gradient, edge_order=1).")
    dflt_blk, dflt_vmem = _default_budgets()
    if max_block_elems is None:
        max_block_elems = dflt_blk
    if vmem_limit_bytes is None:
        vmem_limit_bytes = dflt_vmem

    HW = H * W
    N = B * C
    Cb = _pick_rows_per_block(N, HW, max_block_elems)

    # Lane-dense layout: fold (H, W) onto the last axis — a free (contiguous) reshape.
    x_flat = x.reshape(N, HW)

    # Precomputed per-lane constants: packed edge bits + per-axis stencil scales.
    h = np.arange(H, dtype=np.int32)[:, None]
    w = np.arange(W, dtype=np.int32)[None, :]
    mask2d = ((h == 0).astype(np.int32)
              + (h == H - 1).astype(np.int32) * 2
              + (w == 0).astype(np.int32) * 4
              + (w == W - 1).astype(np.int32) * 8)
    scale_h2d = np.broadcast_to(np.where((h == 0) | (h == H - 1), 1.0, 0.5), (H, W))
    scale_w2d = np.broadcast_to(np.where((w == 0) | (w == W - 1), 1.0, 0.5), (H, W))
    mask_row = jnp.asarray(mask2d.reshape(1, HW), dtype=jnp.int32)
    scale_h_row = jnp.asarray(scale_h2d.reshape(1, HW).astype(np.float32))
    scale_w_row = jnp.asarray(scale_w2d.reshape(1, HW).astype(np.float32))

    n = N * HW
    cost = pl.CostEstimate(
        flops=22 * n,                               # 4 lean stencils + normalization
        transcendentals=n,                          # one rsqrt per element
        bytes_accessed=2 * n * x.dtype.itemsize + 3 * HW * 4,
    )

    kernel = functools.partial(tv_grad_kernel, epsilon=float(epsilon), H=H, W=W)

    out = pl.pallas_call(
        kernel,
        out_shape=jax.ShapeDtypeStruct((N, HW), x.dtype),
        grid=(pl.cdiv(N, Cb),),
        in_specs=[
            pl.BlockSpec((1, HW), lambda i: (0, 0)),    # packed edge-bit row
            pl.BlockSpec((1, HW), lambda i: (0, 0)),    # scale_h
            pl.BlockSpec((1, HW), lambda i: (0, 0)),    # scale_w
            pl.BlockSpec((Cb, HW), lambda i: (i, 0)),   # x (partial last block OK)
        ],
        out_specs=pl.BlockSpec((Cb, HW), lambda i: (i, 0)),
        compiler_params=pltpu.CompilerParams(
            dimension_semantics=("parallel",),
            vmem_limit_bytes=vmem_limit_bytes,
        ),
        cost_estimate=cost,
    )(mask_row, scale_h_row, scale_w_row, x_flat)

    return out.reshape(B, C, H, W)


def tv_grad_ref(x, epsilon=1.0):
    """Plain-JAX reference mirroring the PyTorch module (per 2-D slice)."""
    def one_slice(x_sc):
        u0, u1 = jnp.gradient(x_sc)
        denom = jnp.sqrt(epsilon + u0 ** 2 + u1 ** 2)
        v0 = u0 / denom
        v1 = u1 / denom
        return jnp.gradient(v0)[0] + jnp.gradient(v1)[1]

    return jax.vmap(jax.vmap(one_slice))(x)


if __name__ == "__main__":
    key = jax.random.PRNGKey(0)
    B, C, H, W = 2, 4, 16, 16
    x = jax.random.normal(key, (B, C, H, W), dtype=jnp.float32)

    out = jax.block_until_ready(tv_grad(x, epsilon=1.0))
    ref = jax.block_until_ready(tv_grad_ref(x, epsilon=1.0))

    np.testing.assert_allclose(np.asarray(out), np.asarray(ref), rtol=1e-4, atol=1e-4)

    print("KERNEL_OK")
</pallas_src>

<mosaic_0001>
module attributes {stable_mosaic.version = 11 : i64} {
  func.func @tv_grad_kernel(%arg0: i32, %arg1: memref<1x256xi32, #tpu.memory_space<vmem>>, %arg2: memref<1x256xf32, #tpu.memory_space<vmem>>, %arg3: memref<1x256xf32, #tpu.memory_space<vmem>>, %arg4: memref<8x256xf32, #tpu.memory_space<vmem>>, %arg5: memref<8x256xf32, #tpu.memory_space<vmem>>) attributes {dimension_semantics = [#tpu.dimension_semantics<parallel>], iteration_bounds = array<i64: 1>, scalar_prefetch = 0 : i64, scratch_operands = 0 : i64, tpu.core_type = #tpu.core_type<tc>, window_params = [{pipeline_mode = #tpu.pipeline_mode<synchronous>, transform_indices = @transform_0, window_bounds = array<i64: 1, 256>}, {pipeline_mode = #tpu.pipeline_mode<synchronous>, transform_indices = @transform_1, window_bounds = array<i64: 1, 256>}, {pipeline_mode = #tpu.pipeline_mode<synchronous>, transform_indices = @transform_2, window_bounds = array<i64: 1, 256>}, {transform_indices = @transform_3, window_bounds = array<i64: 8, 256>}, {transform_indices = @transform_4, window_bounds = array<i64: 8, 256>}]} {
    %c0 = arith.constant 0 : index
    %c0_0 = arith.constant 0 : index
    %0 = vector.load %arg4[%c0, %c0_0] : memref<8x256xf32, #tpu.memory_space<vmem>>, vector<8x256xf32>
    %c0_1 = arith.constant 0 : index
    %c0_2 = arith.constant 0 : index
    %1 = vector.load %arg1[%c0_1, %c0_2] : memref<1x256xi32, #tpu.memory_space<vmem>>, vector<1x256xi32>
    %c1_i32 = arith.constant 1 : i32
    %2 = vector.broadcast %c1_i32 : i32 to vector<1x256xi32>
    %3 = arith.andi %1, %2 : vector<1x256xi32>
    %c0_i32 = arith.constant 0 : i32
    %4 = vector.broadcast %c0_i32 : i32 to vector<1x256xi32>
    %5 = arith.cmpi ne, %3, %4 : vector<1x256xi32>
    %c2_i32 = arith.constant 2 : i32
    %6 = vector.broadcast %c2_i32 : i32 to vector<1x256xi32>
    %7 = arith.andi %1, %6 : vector<1x256xi32>
    %c0_i32_3 = arith.constant 0 : i32
    %8 = vector.broadcast %c0_i32_3 : i32 to vector<1x256xi32>
    %9 = arith.cmpi ne, %7, %8 : vector<1x256xi32>
    %c4_i32 = arith.constant 4 : i32
    %10 = vector.broadcast %c4_i32 : i32 to vector<1x256xi32>
    %11 = arith.andi %1, %10 : vector<1x256xi32>
    %c0_i32_4 = arith.constant 0 : i32
    %12 = vector.broadcast %c0_i32_4 : i32 to vector<1x256xi32>
    %13 = arith.cmpi ne, %11, %12 : vector<1x256xi32>
    %c8_i32 = arith.constant 8 : i32
    %14 = vector.broadcast %c8_i32 : i32 to vector<1x256xi32>
    %15 = arith.andi %1, %14 : vector<1x256xi32>
    %c0_i32_5 = arith.constant 0 : i32
    %16 = vector.broadcast %c0_i32_5 : i32 to vector<1x256xi32>
    %17 = arith.cmpi ne, %15, %16 : vector<1x256xi32>
    %c0_6 = arith.constant 0 : index
    %c0_7 = arith.constant 0 : index
    %18 = vector.load %arg2[%c0_6, %c0_7] : memref<1x256xf32, #tpu.memory_space<vmem>>, vector<1x256xf32>
    %c0_8 = arith.constant 0 : index
    %c0_9 = arith.constant 0 : index
    %19 = vector.load %arg3[%c0_8, %c0_9] : memref<1x256xf32, #tpu.memory_space<vmem>>, vector<1x256xf32>
    %c240_i32 = arith.constant 240 : i32
    %20 = tpu.dynamic_rotate %0 by %c240_i32 dim 1 : vector<8x256xf32>, i32 -> vector<8x256xf32>
    %c16_i32 = arith.constant 16 : i32
    %21 = tpu.dynamic_rotate %0 by %c16_i32 dim 1 : vector<8x256xf32>, i32 -> vector<8x256xf32>
    %22 = vector.shape_cast %9 : vector<1x256xi1> to vector<1x256xi1>
    %23 = vector.broadcast %22 : vector<1x256xi1> to vector<8x256xi1>
    %24 = arith.select %23, %0, %20 : vector<8x256xi1>, vector<8x256xf32>
    %25 = vector.shape_cast %5 : vector<1x256xi1> to vector<1x256xi1>
    %26 = vector.broadcast %25 : vector<1x256xi1> to vector<8x256xi1>
    %27 = arith.select %26, %0, %21 : vector<8x256xi1>, vector<8x256xf32>
    %28 = arith.subf %24, %27 : vector<8x256xf32>
    %29 = vector.broadcast %18 : vector<1x256xf32> to vector<8x256xf32>
    %30 = arith.mulf %28, %29 : vector<8x256xf32>
    %c255_i32 = arith.constant 255 : i32
    %31 = tpu.dynamic_rotate %0 by %c255_i32 dim 1 : vector<8x256xf32>, i32 -> vector<8x256xf32>
    %c1_i32_10 = arith.constant 1 : i32
    %32 = tpu.dynamic_rotate %0 by %c1_i32_10 dim 1 : vector<8x256xf32>, i32 -> vector<8x256xf32>
    %33 = vector.shape_cast %17 : vector<1x256xi1> to vector<1x256xi1>
    %34 = vector.broadcast %33 : vector<1x256xi1> to vector<8x256xi1>
    %35 = arith.select %34, %0, %31 : vector<8x256xi1>, vector<8x256xf32>
    %36 = vector.shape_cast %13 : vector<1x256xi1> to vector<1x256xi1>
    %37 = vector.broadcast %36 : vector<1x256xi1> to vector<8x256xi1>
    %38 = arith.select %37, %0, %32 : vector<8x256xi1>, vector<8x256xf32>
    %39 = arith.subf %35, %38 : vector<8x256xf32>
    %40 = vector.broadcast %19 : vector<1x256xf32> to vector<8x256xf32>
    %41 = arith.mulf %39, %40 : vector<8x256xf32>
    %42 = arith.mulf %30, %30 : vector<8x256xf32>
    %cst = arith.constant 1.000000e+00 : f32
    %43 = vector.broadcast %cst : f32 to vector<8x256xf32>
    %44 = arith.addf %43, %42 : vector<8x256xf32>
    %45 = arith.mulf %41, %41 : vector<8x256xf32>
    %46 = arith.addf %44, %45 : vector<8x256xf32>
    %47 = math.rsqrt %46 : vector<8x256xf32>
    %48 = arith.mulf %30, %47 : vector<8x256xf32>
    %49 = arith.mulf %41, %47 : vector<8x256xf32>
    %c240_i32_11 = arith.constant 240 : i32
    %50 = tpu.dynamic_rotate %48 by %c240_i32_11 dim 1 : vector<8x256xf32>, i32 -> vector<8x256xf32>
    %c16_i32_12 = arith.constant 16 : i32
    %51 = tpu.dynamic_rotate %48 by %c16_i32_12 dim 1 : vector<8x256xf32>, i32 -> vector<8x256xf32>
    %52 = vector.shape_cast %9 : vector<1x256xi1> to vector<1x256xi1>
    %53 = vector.broadcast %52 : vector<1x256xi1> to vector<8x256xi1>
    %54 = arith.select %53, %48, %50 : vector<8x256xi1>, vector<8x256xf32>
    %55 = vector.shape_cast %5 : vector<1x256xi1> to vector<1x256xi1>
    %56 = vector.broadcast %55 : vector<1x256xi1> to vector<8x256xi1>
    %57 = arith.select %56, %48, %51 : vector<8x256xi1>, vector<8x256xf32>
    %58 = arith.subf %54, %57 : vector<8x256xf32>
    %59 = vector.broadcast %18 : vector<1x256xf32> to vector<8x256xf32>
    %60 = arith.mulf %58, %59 : vector<8x256xf32>
    %c255_i32_13 = arith.constant 255 : i32
    %61 = tpu.dynamic_rotate %49 by %c255_i32_13 dim 1 : vector<8x256xf32>, i32 -> vector<8x256xf32>
    %c1_i32_14 = arith.constant 1 : i32
    %62 = tpu.dynamic_rotate %49 by %c1_i32_14 dim 1 : vector<8x256xf32>, i32 -> vector<8x256xf32>
    %63 = vector.shape_cast %17 : vector<1x256xi1> to vector<1x256xi1>
    %64 = vector.broadcast %63 : vector<1x256xi1> to vector<8x256xi1>
    %65 = arith.select %64, %49, %61 : vector<8x256xi1>, vector<8x256xf32>
    %66 = vector.shape_cast %13 : vector<1x256xi1> to vector<1x256xi1>
    %67 = vector.broadcast %66 : vector<1x256xi1> to vector<8x256xi1>
    %68 = arith.select %67, %49, %62 : vector<8x256xi1>, vector<8x256xf32>
    %69 = arith.subf %65, %68 : vector<8x256xf32>
    %70 = vector.broadcast %19 : vector<1x256xf32> to vector<8x256xf32>
    %71 = arith.mulf %69, %70 : vector<8x256xf32>
    %72 = arith.addf %60, %71 : vector<8x256xf32>
    %c0_15 = arith.constant 0 : index
    %c0_16 = arith.constant 0 : index
    %73 = vector.load %arg5[%c0_15, %c0_16] : memref<8x256xf32, #tpu.memory_space<vmem>>, vector<8x256xf32>
    tpu.vector_store %arg5[%c0_15, %c0_16], %72 {strides = array<i32>} : memref<8x256xf32, #tpu.memory_space<vmem>>, vector<8x256xf32>,
    return
  }
  func.func @transform_0(%arg0: i32) -> (i32, i32) {
    %c0_i32 = arith.constant 0 : i32
    %c0_i32_0 = arith.constant 0 : i32
    %c0_i32_1 = arith.constant 0 : i32
    return %c0_i32, %c0_i32_0 : i32, i32
  }
  func.func @transform_1(%arg0: i32) -> (i32, i32) {
    %c0_i32 = arith.constant 0 : i32
    %c0_i32_0 = arith.constant 0 : i32
    %c0_i32_1 = arith.constant 0 : i32
    return %c0_i32, %c0_i32_0 : i32, i32
  }
  func.func @transform_2(%arg0: i32) -> (i32, i32) {
    %c0_i32 = arith.constant 0 : i32
    %c0_i32_0 = arith.constant 0 : i32
    %c0_i32_1 = arith.constant 0 : i32
    return %c0_i32, %c0_i32_0 : i32, i32
  }
  func.func @transform_3(%arg0: i32) -> (i32, i32) {
    %c0_i32 = arith.constant 0 : i32
    %c0_i32_0 = arith.constant 0 : i32
    return %arg0, %c0_i32 : i32, i32
  }
  func.func @transform_4(%arg0: i32) -> (i32, i32) {
    %c0_i32 = arith.constant 0 : i32
    %c0_i32_0 = arith.constant 0 : i32
    return %arg0, %c0_i32 : i32, i32
  }
}

</mosaic_0001>

<bundles_post_ra>
// kernel: tpu_custom_call.1
= control target key start
LH: loop header
LB: loop body
LE: loop exit
PB: predicated region body
PF: predicated region fallthrough
CT: control target
= control target key end

     0   :  { %9 = vsyncpa [#allocation3], 0  ;;  %s554_s0 = inlined_call_operand.hbm [shape: s32[1,256], index: 0, kind: input, shape index: {}]   ;;  %s555_s1 = inlined_call_operand.vmem [shape: f32[1,256], index: 1, kind: input, shape index: {}]   ;;  %s556_s2 = inlined_call_operand.vmem [shape: f32[1,256], index: 2, kind: input, shape index: {}]   ;;  %s557_s3 = inlined_call_operand.hbm [shape: f32[8,256], index: 3, kind: input, shape index: {}]   ;;  %s558_s4 = inlined_call_operand.hbm [shape: f32[8,256], index: 4, kind: output, shape index: {}]  }
   0x1   :  { %10 = vsyncpa [#allocation6], 0 }
   0x2   :  { %11 = vsyncpa [#allocation4], 0  ;;  %s325_s15 = smov [#allocation2]   ;;  %s326_s17 = smov [#allocation5]  }
   0x3   :  { %s18_s16 = sshll.u32 %s325_s15, 4  ;;  %s32_s18 = sshll.u32 %s326_s17, 4  ;;  %s19_s16 = int_to_ptr.vmem [resolvable:$true] %s18_s16  ;;  %s33_s18 = int_to_ptr.vmem [resolvable:$true] %s32_s18 }
   0x4   :  { %s253_s21 = scalar_lea.hbm %s554_s0, 32 }
   0x5   :  { %p254_p0 = scmp.ne.s32.totalorder %s554_s0, %s253_s21  ;;  %p257_p1 = scmp.lt.u32.totalorder %s253_s21, %s554_s0 }
   0x7   :  { %p259_p2 = pnand %p257_p1, %p254_p0 }
   0x9   :  { %262 = shalt.err (!%p259_p2)
}
   0xa   :  { %s263_s26 = scalar_lea.vmem %s19_s16, 32  ;;  %p268_p4 = scmp.lt.s32.totalorder %s19_s16, %s19_s16 }
   0xb   :  { %p264_p3 = scmp.ne.s32.totalorder %s19_s16, %s263_s26  ;;  %p269_p5 = scmp.lt.s32.totalorder %s263_s26, %s263_s26 }
   0xd   :  { %p270_p6 = por %p269_p5, %p268_p4 }
   0xf   :  { %p271_p7 = pnand %p270_p6, %p264_p3 }
  0x11   :  { %274 = shalt.err (!%p271_p7)
}
  0x12   :  { %21 = dma.hbm_to_vmem [thread:$0]  %s554_s0, 32, %s19_s16, [#allocation3]  }
  0x13   :  { %s275_s5 = scalar_lea.hbm %s557_s3, 256 }
  0x14   :  { %p276_p8 = scmp.ne.s32.totalorder %s557_s3, %s275_s5  ;;  %p279_p9 = scmp.lt.u32.totalorder %s275_s5, %s557_s3 }
  0x16   :  { %p281_p10 = pnand %p279_p9, %p276_p8 }
  0x18   :  { %284 = shalt.err (!%p281_p10)
}
  0x19   :  { %s285_s10 = scalar_lea.vmem %s33_s18, 256  ;;  %p290_p12 = scmp.lt.s32.totalorder %s33_s18, %s33_s18 }
  0x1a   :  { %p286_p11 = scmp.ne.s32.totalorder %s33_s18, %s285_s10  ;;  %p291_p13 = scmp.lt.s32.totalorder %s285_s10, %s285_s10 }
  0x1c   :  { %p292_p0 = por %p291_p13, %p290_p12 }
  0x1e   :  { %p293_p1 = pnand %p292_p0, %p286_p11 }
  0x20   :  { %296 = shalt.err (!%p293_p1)
}
  0x21   :  { %35 = dma.hbm_to_vmem [thread:$0]  %s557_s3, 256, %s33_s18, [#allocation6]  }
  0x22   :  { %319 = dma.done.wait [#allocation3], 32  }
  0x23   :  { %320 = vsyncadd [#allocation3], 4294967264 }
  0x24   :  { %321 = dma.done.wait [#allocation6], 256  }
  0x25   :  { %322 = vsyncadd [#allocation6], 4294967040  ;;  %v382_v0 = vld [vmem:[#allocation5] sm:$0xff]  ;;  %s327_s12 = smov 16   ;;  %s328_s13 = smov 112   ;;  %v388_v1 = vld [vmem:[#allocation5 + $0x8] sm:$0xff]  ;;  %v59_v3 = vlaneseq }
  0x26   :  { %64 = vrot.lane.b32.xlu1 %v382_v0, %s327_s12  ;;  %55 = vrot.lane.b32.xlu0 %v382_v0, %s328_s13  ;;  %s329_s3 = smov 127   ;;  %s330_s14 = smov 1   ;;  %v44_v2 = vld [vmem:[#allocation2] sm:$0x3]  ;;  %v331_v11 = vmov 0  }
  0x27   :  { %v45_v4 = vand.u32 1, %v44_v2  ;;  %v47_v5 = vand.u32 2, %v44_v2  ;;  %v73_v6 = vshrl.u32 %v59_v3, 7  ;;  %v51_v7 = vand.u32 8, %v44_v2  ;;  %v53_v28 = vld [vmem:[%s555_s1] sm:$0x3] }
  0x28   :  { %v49_v8 = vand.u32 4, %v44_v2  ;;  %v402_v14 = vand.u32 127, %v59_v3  ;;  %v54_v50 = vld [vmem:[%s556_s2] sm:$0x3]  ;;  %s332_s2 = smov [#allocation7]  }
  0x29   :  { %vm46_vm0 = vcmp.ne.s32.totalorder %v45_v4, 0  ;;  %vm48_vm1 = vcmp.ne.s32.totalorder %v47_v5, 0  ;;  %v74_v9 = vsub.s32 0, %v73_v6  ;;  %v78_v10 = vsub.s32 1, %v73_v6  ;;  %s231_s18 = sshll.u32 %s332_s2, 4  ;;  %s232_s18 = int_to_ptr.vmem [resolvable:$true] %s231_s18 }
  0x2a   :  { %66 = vrot.lane.b32.xlu1 %v388_v1, %s327_s12  ;;  %57 = vrot.lane.b32.xlu0 %v388_v1, %s328_s13  ;;  %v84_v12 = vsel %vm46_vm0, 1, %v331_v11  ;;  %v71_v13 = vsel %vm48_vm1, 1, %v331_v11  ;;  %vm52_vm2 = vcmp.ne.s32.totalorder %v51_v7, 0  ;;  %vm50_vm3 = vcmp.ne.s32.totalorder %v49_v8, 0  ;;  %s297_s19 = scalar_lea.vmem %s232_s18, 256  ;;  %p302_p3 = scmp.lt.s32.totalorder %s232_s18, %s232_s18 }
  0x2b   :  { %v88_v15 = vrot.slane %v84_v12, %v74_v9  ;;  %v92_v16 = vrot.slane %v84_v12, %v78_v10  ;;  %v75_v17 = vrot.slane %v71_v13, %v74_v9  ;;  %v79_v18 = vrot.slane %v71_v13, %v78_v10  ;;  %p298_p2 = scmp.ne.s32.totalorder %s232_s18, %s297_s19  ;;  %p303_p4 = scmp.lt.s32.totalorder %s297_s19, %s297_s19 }
  0x2c   :  { %v126_v21 = vsel %vm52_vm2, 1, %v331_v11  ;;  %v139_v22 = vsel %vm50_vm3, 1, %v331_v11  ;;  %vm68_vm4 = vcmp.lt.s32.totalorder %v402_v14, 16  ;;  %vm61_vm5 = vcmp.lt.s32.totalorder %v402_v14, 112 }
  0x2d   :  { %vm406_vm6 = vcmp.eq.s32.totalorder %v88_v15, 1  ;;  %vm410_vm7 = vcmp.eq.s32.totalorder %v92_v16, 1  ;;  %vm414_vm8 = vcmp.eq.s32.totalorder %v75_v17, 1  ;;  %vm418_vm9 = vcmp.eq.s32.totalorder %v79_v18, 1  ;;  %p304_p5 = por %p303_p4, %p302_p3 }
  0x2e   :  { %114 = vrot.lane.b32.xlu1 %v388_v1, %s329_s3  ;;  %112 = vrot.lane.b32.xlu0 %v382_v0, %s329_s3  ;;  %v130_v30 = vrot.slane %v126_v21, %v74_v9  ;;  %v134_v31 = vrot.slane %v126_v21, %v78_v10  ;;  %v143_v32 = vrot.slane %v139_v22, %v74_v9  ;;  %vm116_vm10 = vcmp.lt.s32.totalorder %v402_v14, 127 }
  0x2f   :  { %v147_v33 = vrot.slane %v139_v22, %v78_v10  ;;  %v445_v42 = vrot.slane %v53_v28, %v74_v9  ;;  %v447_v43 = vrot.slane %v53_v28, %v78_v10  ;;  %vm123_vm11 = vcmp.lt.s32.totalorder %v402_v14, 1  ;;  %p305_p6 = pnand %p304_p5, %p298_p2 }
  0x30   :  { %vm451_vm12 = vcmp.eq.s32.totalorder %v130_v30, 1  ;;  %vm455_vm13 = vcmp.eq.s32.totalorder %v134_v31, 1  ;;  %vm462_vm14 = vcmp.eq.s32.totalorder %v143_v32, 1  ;;  %v476_v59 = vrot.slane %v54_v50, %v74_v9 }
  0x31   :  { %vm466_vm15 = vcmp.eq.s32.totalorder %v147_v33, 1  ;;  %v478_v60 = vrot.slane %v54_v50, %v78_v10 }
  0x32   :  { %121 = vrot.lane.b32.xlu1 %v388_v1, %s330_s14  ;;  %119 = vrot.lane.b32.xlu0 %v382_v0, %s330_s14 }
  0x98   :  { %v65_v19 = vpop.permute.xlu1 %64  ;;  %v56_v20 = vpop.permute.xlu0 %55 }
  0x9c   :  { %v67_v27 = vpop.permute.xlu1 %66  ;;  %v58_v29 = vpop.permute.xlu0 %57 }
  0x9d   :  { %v69_v34 = vsel %vm68_vm4, %v65_v19, %v67_v27  ;;  %v70_v35 = vsel %vm68_vm4, %v67_v27, %v65_v19  ;;  %v62_v36 = vsel %vm61_vm5, %v56_v20, %v58_v29  ;;  %v63_v37 = vsel %vm61_vm5, %v58_v29, %v56_v20 }
  0x9e   :  { %v95_v38 = vsel %vm406_vm6, %v382_v0, %v70_v35  ;;  %v96_v39 = vsel %vm410_vm7, %v388_v1, %v69_v34  ;;  %v82_v40 = vsel %vm414_vm8, %v382_v0, %v62_v36  ;;  %v83_v41 = vsel %vm418_vm9, %v388_v1, %v63_v37 }
  0x9f   :  { %v97_v44 = vsub.f32 %v82_v40, %v95_v38  ;;  %v98_v45 = vsub.f32 %v83_v41, %v96_v39 }
  0xa0   :  { %v115_v46 = vpop.permute.xlu1 %114  ;;  %v113_v47 = vpop.permute.xlu0 %112 }
  0xa1   :  { %v110_v53 = vmul.f32 %v445_v42, %v97_v44  ;;  %v111_v54 = vmul.f32 %v447_v43, %v98_v45  ;;  %v117_v55 = vsel %vm116_vm10, %v113_v47, %v115_v46  ;;  %v118_v56 = vsel %vm116_vm10, %v115_v46, %v113_v47 }
  0xa2   :  { %v137_v63 = vsel %vm451_vm12, %v382_v0, %v117_v55  ;;  %v138_v2 = vsel %vm455_vm13, %v388_v1, %v118_v56 }
  0xa3   :  { %v167_v5 = vmul.f32 %v110_v53, %v110_v53  ;;  %v168_v6 = vmul.f32 %v111_v54, %v111_v54 }
  0xa4   :  { %v122_v57 = vpop.permute.xlu1 %121  ;;  %v120_v58 = vpop.permute.xlu0 %119 }
  0xa5   :  { %v124_v61 = vsel %vm123_vm11, %v120_v58, %v122_v57  ;;  %v125_v62 = vsel %vm123_vm11, %v122_v57, %v120_v58  ;;  %v169_v11 = vadd.f32 1.0, %v167_v5  ;;  %v170_v12 = vadd.f32 1.0, %v168_v6 }
  0xa6   :  { %v150_v3 = vsel %vm462_vm14, %v382_v0, %v125_v62  ;;  %v151_v4 = vsel %vm466_vm15, %v388_v1, %v124_v61 }
  0xa7   :  { %v152_v7 = vsub.f32 %v137_v63, %v150_v3  ;;  %v153_v8 = vsub.f32 %v138_v2, %v151_v4 }
  0xa9   :  { %v165_v9 = vmul.f32 %v476_v59, %v152_v7  ;;  %v166_v10 = vmul.f32 %v478_v60, %v153_v8 }
  0xab   :  { %v171_v13 = vmul.f32 %v165_v9, %v165_v9  ;;  %v172_v15 = vmul.f32 %v166_v10, %v166_v10 }
  0xad   :  { %v173_v16 = vadd.f32 %v171_v13, %v169_v11  ;;  %v174_v17 = vadd.f32 %v172_v15, %v170_v12 }
  0xaf   :  { %249 = vrsqrt.f32 %v173_v16 }
  0xb0   :  { %251 = vrsqrt.f32 %v174_v17 }
  0xb9   :  { %v250_v0 = vpop.eup %249 }
  0xba   :  { %v252_v18 = vpop.eup %251  ;;  %v177_v19 = vmul.f32 %v250_v0, %v110_v53  ;;  %v179_v20 = vmul.f32 %v250_v0, %v165_v9 }
  0xbb   :  { %v178_v1 = vmul.f32 %v252_v18, %v111_v54  ;;  %v180_v21 = vmul.f32 %v252_v18, %v166_v10 }
  0xbc   :  { %181 = vrot.lane.b32.xlu0 %v177_v19, %s328_s13 }
  0xbd   :  { %183 = vrot.lane.b32.xlu1 %v178_v1, %s328_s13 }
  0xc0   :  { %187 = vrot.lane.b32.xlu0 %v177_v19, %s327_s12 }
  0xc1   :  { %189 = vrot.lane.b32.xlu1 %v178_v1, %s327_s12 }
  0xc4   :  { %201 = vrot.lane.b32.xlu0 %v179_v20, %s329_s3 }
  0xc5   :  { %203 = vrot.lane.b32.xlu1 %v180_v21, %s329_s3 }
  0xc8   :  { %207 = vrot.lane.b32.xlu0 %v179_v20, %s330_s14 }
  0xc9   :  { %209 = vrot.lane.b32.xlu1 %v180_v21, %s330_s14 }
 0x12e   :  { %v182_v22 = vpop.permute.xlu0 %181 }
 0x12f   :  { %v184_v27 = vpop.permute.xlu1 %183 }
 0x130   :  { %v185_v34 = vsel %vm61_vm5, %v182_v22, %v184_v27  ;;  %v186_v35 = vsel %vm61_vm5, %v184_v27, %v182_v22 }
 0x131   :  { %v193_v41 = vsel %vm414_vm8, %v177_v19, %v185_v34  ;;  %v194_v44 = vsel %vm418_vm9, %v178_v1, %v186_v35 }
 0x132   :  { %v188_v28 = vpop.permute.xlu0 %187 }
 0x133   :  { %v190_v29 = vpop.permute.xlu1 %189 }
 0x134   :  { %v191_v30 = vsel %vm68_vm4, %v188_v28, %v190_v29  ;;  %v192_v31 = vsel %vm68_vm4, %v190_v29, %v188_v28 }
 0x135   :  { %v195_v36 = vsel %vm406_vm6, %v177_v19, %v192_v31  ;;  %v196_v37 = vsel %vm410_vm7, %v178_v1, %v191_v30 }
 0x136   :  { %v202_v32 = vpop.permute.xlu0 %201  ;;  %v197_v46 = vsub.f32 %v193_v41, %v195_v36  ;;  %v198_v23 = vsub.f32 %v194_v44, %v196_v37 }
 0x137   :  { %v204_v33 = vpop.permute.xlu1 %203 }
 0x138   :  { %v205_v38 = vsel %vm116_vm10, %v202_v32, %v204_v33  ;;  %v206_v39 = vsel %vm116_vm10, %v204_v33, %v202_v32  ;;  %v199_v56 = vmul.f32 %v197_v46, %v445_v42  ;;  %v200_v14 = vmul.f32 %v198_v23, %v447_v43 }
 0x139   :  { %v213_v50 = vsel %vm451_vm12, %v179_v20, %v205_v38  ;;  %v214_v53 = vsel %vm455_vm13, %v180_v21, %v206_v39 }
 0x13a   :  { %v208_v40 = vpop.permute.xlu0 %207 }
 0x13b   :  { %v210_v45 = vpop.permute.xlu1 %209 }
 0x13c   :  { %v211_v24 = vsel %vm123_vm11, %v208_v40, %v210_v45  ;;  %v212_v47 = vsel %vm123_vm11, %v210_v45, %v208_v40 }
 0x13d   :  { %v215_v25 = vsel %vm462_vm14, %v179_v20, %v212_v47  ;;  %v216_v26 = vsel %vm466_vm15, %v180_v21, %v211_v24 }
 0x13e   :  { %v217_v54 = vsub.f32 %v213_v50, %v215_v25  ;;  %v218_v55 = vsub.f32 %v214_v53, %v216_v26 }
 0x140   :  { %v219_v48 = vmul.f32 %v217_v54, %v476_v59  ;;  %v220_v57 = vmul.f32 %v218_v55, %v478_v60 }
 0x142   :  { %v221_v49 = vadd.f32 %v219_v48, %v199_v56  ;;  %v222_v58 = vadd.f32 %v220_v57, %v200_v14 }
 0x144   :  { %223 = vst [vmem:[#allocation7] sm:$0xff] %v221_v49  ;;  %224 = vst [vmem:[#allocation7 + $0x8] sm:$0xff] %v222_v58 }
 0x145   :  { %308 = shalt.err (!%p305_p6)
}
 0x146   :  { %s309_s22 = scalar_lea.hbm %s558_s4, 256 }
 0x147   :  { %p310_p7 = scmp.ne.s32.totalorder %s558_s4, %s309_s22  ;;  %p313_p8 = scmp.lt.u32.totalorder %s309_s22, %s558_s4 }
 0x149   :  { %p315_p9 = pnand %p313_p8, %p310_p7 }
 0x14b   :  { %318 = shalt.err (!%p315_p9)
}
 0x14c   :  { %234 = dma.vmem_to_hbm [thread:$0]  %s232_s18, 256, %s558_s4, [#allocation4]  }
 0x14d   :  { %323 = dma.done.wait [#allocation4], 256  }
 0x14e   :  { %324 = vsyncadd [#allocation4], 4294967040 }
 0x14f   :  { %238 = vsyncpa [#allocation3], 1 }
 0x150   :  { %239 = vsyncpa [#allocation6], 1 }
 0x151   :  { %240 = vsyncpa [#allocation4], 1 }

</bundles_post_ra>
